<compile_context>
chip_gen: v7x
topology: tpu7x:2x2x1
jax: 0.10.0
libtpu: 0.0.40
codegen_flags: <defaults>
</compile_context>

<pallas_src>
import functools

import jax
import jax.numpy as jnp
from jax.experimental import pallas as pl
from jax.experimental.pallas import tpu as pltpu


def mlp_kernel(x_ref, w1_ref, b1_ref, w2_ref, b2_ref, w3_ref, b3_ref,
               w4_ref, b4_ref, o_ref, *, approx_rcp):
    # x_ref is (in_dim, bm): batch on the lane axis.  Weights are PyTorch-
    # native (out, in); biases are (out, 1).  Every layer is W @ h + b so all
    # intermediates are (features, bm) -> lane-dense vregs and unmasked stores.
    x = x_ref[...]

    # Layer 1: Linear + Tanh (MXU accumulates f32; activations stay f32).
    h = jnp.tanh(
        jnp.dot(w1_ref[...], x, preferred_element_type=jnp.float32)
        + b1_ref[...])
    # Layer 2: Linear + Tanh.
    h = jnp.tanh(
        jnp.dot(w2_ref[...], h, preferred_element_type=jnp.float32)
        + b2_ref[...])
    # Layer 3: Linear + Sigmoid, built from exp (EUP) + reciprocal.
    z = jnp.dot(w3_ref[...], h, preferred_element_type=jnp.float32) + b3_ref[...]
    h = pl.reciprocal(1.0 + jnp.exp(-z), approx=approx_rcp)
    # Output layer: Linear, no activation.
    o_ref[...] = (
        jnp.dot(w4_ref[...], h, preferred_element_type=jnp.float32)
        + b4_ref[...]).astype(o_ref.dtype)


def _num_tensorcores():
    """Best-effort TensorCore count (v7x has 2); safe fallback of 1."""
    try:
        info = pltpu.get_tpu_info()
        for attr in ("num_cores", "core_count", "tensorcores_per_chip",
                     "num_tensorcores"):
            v = getattr(info, attr, None)
            if isinstance(v, int) and v > 0:
                return v
    except Exception:
        pass
    return 1


_MIN_SPLIT_ROWS = 1024  # min rows/tile before a megacore split pays off


def _choose_block_m(batch, block_m, num_cores):
    """Pick a lane-aligned batch tile.

    Single tile whenever the batch fits (no forced split on single-TC chips);
    split into two 128-aligned shards only on 2-TC chips with enough work.
    """
    if batch <= block_m:
        if num_cores >= 2 and batch >= 2 * _MIN_SPLIT_ROWS:
            half = pl.cdiv(batch, 2)
            return max(128, pl.cdiv(half, 128) * 128)
        return batch
    return max(128, (block_m // 128) * 128)


def neural_network_forward(x, params, *, block_m=4096, compute_dtype=None):
    """Fused MLP forward.  x: (B, in_dim); weights PyTorch-native (out, in).

    compute_dtype=None (default) keeps exact f32 PyTorch semantics; pass
    jnp.bfloat16 to stream x / weights in bf16 (f32 accumulation, f32
    activations) and halve HBM traffic on the batch-streamed input.
    """
    (w1, b1), (w2, b2), (w3, b3), (w4, b4) = params
    B, in_dim = x.shape
    h1d, h2d, h3d, out_dim = w1.shape[0], w2.shape[0], w3.shape[0], w4.shape[0]
    out_dtype = w4.dtype

    # Batch onto the lane axis; wrapper-side transpose is cheap layout plumbing.
    x_t = x.T  # (in_dim, B)
    if compute_dtype is not None:
        x_t = x_t.astype(compute_dtype)
        w1, w2, w3, w4 = (w.astype(compute_dtype) for w in (w1, w2, w3, w4))
    b1, b2, b3, b4 = (b.astype(jnp.float32) for b in (b1, b2, b3, b4))

    bm = _choose_block_m(B, block_m, _num_tensorcores())
    grid = (pl.cdiv(B, bm),)

    def resident(arr):
        # Whole (tiny) array resident in VMEM; same block every grid step.
        return pl.BlockSpec(arr.shape, lambda i: (0,) * arr.ndim)

    approx_rcp = (compute_dtype is not None
                  and jnp.dtype(compute_dtype).itemsize < 4)

    itemsize = jnp.dtype(x_t.dtype).itemsize
    weight_bytes = sum(int(a.size) * jnp.dtype(a.dtype).itemsize
                       for a in (w1, b1, w2, b2, w3, b3, w4, b4))
    cost = pl.CostEstimate(
        flops=2 * B * (in_dim * h1d + h1d * h2d + h2d * h3d + h3d * out_dim),
        transcendentals=B * (h1d + h2d + 2 * h3d),
        bytes_accessed=B * in_dim * itemsize
        + B * out_dim * jnp.dtype(out_dtype).itemsize + weight_bytes,
    )

    out_t = pl.pallas_call(
        functools.partial(mlp_kernel, approx_rcp=approx_rcp),
        out_shape=jax.ShapeDtypeStruct((out_dim, B), out_dtype),
        grid_spec=pltpu.PrefetchScalarGridSpec(
            num_scalar_prefetch=0,
            grid=grid,
            in_specs=[
                pl.BlockSpec((in_dim, bm), lambda i: (0, i)),
                resident(w1), resident(b1),
                resident(w2), resident(b2),
                resident(w3), resident(b3),
                resident(w4), resident(b4),
            ],
            out_specs=pl.BlockSpec((out_dim, bm), lambda i: (0, i)),
        ),
        compiler_params=pltpu.CompilerParams(
            dimension_semantics=("parallel",)),
        cost_estimate=cost,
    )(x_t, w1, b1, w2, b2, w3, b3, w4, b4)

    return out_t.T  # back to (B, out_dim)


def init_params(key, input_dim, h1, h2, h3, output_dim, dtype=jnp.float32):
    """PyTorch-style init, PyTorch-native layout: W (out,in), b (out,1)."""
    dims = [(input_dim, h1), (h1, h2), (h2, h3), (h3, output_dim)]
    params = []
    for (fan_in, fan_out) in dims:
        key, kw, kb = jax.random.split(key, 3)
        bound = 1.0 / (fan_in ** 0.5)
        w = jax.random.uniform(kw, (fan_out, fan_in), dtype,
                               minval=-bound, maxval=bound)
        b = jax.random.uniform(kb, (fan_out, 1), dtype,
                               minval=-bound, maxval=bound)
        params.append((w, b))
    return params


def reference_forward(x, params, compute_dtype=None):
    """Pure-JAX reference; mirrors the kernel's optional bf16 streaming
    (only x and weights quantized; activations / accumulation stay f32)."""
    cast = ((lambda v: v.astype(compute_dtype)) if compute_dtype is not None
            else (lambda v: v))
    acts = [jnp.tanh, jnp.tanh, jax.nn.sigmoid, None]
    h = cast(x)
    for (w, b), act in zip(params, acts):
        h = (jnp.dot(h, cast(w).T, preferred_element_type=jnp.float32)
             + b.reshape(1, -1).astype(jnp.float32))
        if act is not None:
            h = act(h)
    return h


if __name__ == "__main__":
    # Shapes consistent with the module: Neural_Network(16, 32, 32, 16, 4)
    batch, input_dim, h1, h2, h3, output_dim = 64, 16, 32, 32, 16, 4

    key = jax.random.PRNGKey(0)
    key, kx = jax.random.split(key)
    x = jax.random.normal(kx, (batch, input_dim), dtype=jnp.float32)
    params = init_params(key, input_dim, h1, h2, h3, output_dim)

    # Default f32 path: exact match against PyTorch-semantics reference.
    out = jax.block_until_ready(neural_network_forward(x, params))
    ref = reference_forward(x, params)
    assert out.shape == (batch, output_dim)
    assert out.dtype == jnp.float32
    assert jnp.allclose(out, ref, atol=1e-5, rtol=1e-5)

    # Ragged multi-tile path (B=300, bm=128 -> 3 tiles, masked last tile).
    x2 = jax.random.normal(jax.random.PRNGKey(1), (300, input_dim),
                           dtype=jnp.float32)
    out2 = jax.block_until_ready(
        neural_network_forward(x2, params, block_m=128))
    ref2 = reference_forward(x2, params)
    assert jnp.allclose(out2, ref2, atol=1e-5, rtol=1e-5)

    # Opt-in bf16 streaming path (x / weights quantized, f32 accumulate).
    out_bf = jax.block_until_ready(
        neural_network_forward(x, params, compute_dtype=jnp.bfloat16))
    ref_bf = reference_forward(x, params, compute_dtype=jnp.bfloat16)
    assert jnp.allclose(out_bf, ref_bf, atol=3e-3, rtol=3e-3)

    print("KERNEL_OK")
</pallas_src>

<mosaic_0001>
module attributes {stable_mosaic.version = 11 : i64} {
  func.func @mlp_kernel(%arg0: i32, %arg1: memref<16x64xf32, #tpu.memory_space<vmem>>, %arg2: memref<32x16xf32, #tpu.memory_space<vmem>>, %arg3: memref<32x1xf32, #tpu.memory_space<vmem>>, %arg4: memref<32x32xf32, #tpu.memory_space<vmem>>, %arg5: memref<32x1xf32, #tpu.memory_space<vmem>>, %arg6: memref<16x32xf32, #tpu.memory_space<vmem>>, %arg7: memref<16x1xf32, #tpu.memory_space<vmem>>, %arg8: memref<4x16xf32, #tpu.memory_space<vmem>>, %arg9: memref<4x1xf32, #tpu.memory_space<vmem>>, %arg10: memref<4x64xf32, #tpu.memory_space<vmem>>) attributes {dimension_semantics = [#tpu.dimension_semantics<parallel>], iteration_bounds = array<i64: 1>, scalar_prefetch = 0 : i64, scratch_operands = 0 : i64, tpu.core_type = #tpu.core_type<tc>, window_params = [{transform_indices = @transform_0, window_bounds = array<i64: 16, 64>}, {pipeline_mode = #tpu.pipeline_mode<synchronous>, transform_indices = @transform_1, window_bounds = array<i64: 32, 16>}, {pipeline_mode = #tpu.pipeline_mode<synchronous>, transform_indices = @transform_2, window_bounds = array<i64: 32, 1>}, {pipeline_mode = #tpu.pipeline_mode<synchronous>, transform_indices = @transform_3, window_bounds = array<i64: 32, 32>}, {pipeline_mode = #tpu.pipeline_mode<synchronous>, transform_indices = @transform_4, window_bounds = array<i64: 32, 1>}, {pipeline_mode = #tpu.pipeline_mode<synchronous>, transform_indices = @transform_5, window_bounds = array<i64: 16, 32>}, {pipeline_mode = #tpu.pipeline_mode<synchronous>, transform_indices = @transform_6, window_bounds = array<i64: 16, 1>}, {pipeline_mode = #tpu.pipeline_mode<synchronous>, transform_indices = @transform_7, window_bounds = array<i64: 4, 16>}, {pipeline_mode = #tpu.pipeline_mode<synchronous>, transform_indices = @transform_8, window_bounds = array<i64: 4, 1>}, {transform_indices = @transform_9, window_bounds = array<i64: 4, 64>}]} {
    %c0 = arith.constant 0 : index
    %c0_0 = arith.constant 0 : index
    %0 = vector.load %arg1[%c0, %c0_0] : memref<16x64xf32, #tpu.memory_space<vmem>>, vector<16x64xf32>
    %c0_1 = arith.constant 0 : index
    %c0_2 = arith.constant 0 : index
    %1 = vector.load %arg2[%c0_1, %c0_2] : memref<32x16xf32, #tpu.memory_space<vmem>>, vector<32x16xf32>
    %cst = arith.constant dense<0.000000e+00> : vector<32x64xf32>
    %2 = tpu.matmul %1, %0, %cst {dimension_numbers = #tpu.dot_dimension_numbers<[1], [0], [0], [1], [0, 0, 1, 1], [], []>} : vector<32x16xf32>, vector<16x64xf32>, vector<32x64xf32> -> vector<32x64xf32>
    %c0_3 = arith.constant 0 : index
    %c0_4 = arith.constant 0 : index
    %3 = vector.load %arg3[%c0_3, %c0_4] : memref<32x1xf32, #tpu.memory_space<vmem>>, vector<32x1xf32>
    %4 = vector.broadcast %3 : vector<32x1xf32> to vector<32x64xf32>
    %5 = arith.addf %2, %4 : vector<32x64xf32>
    %6 = math.tanh %5 : vector<32x64xf32>
    %c0_5 = arith.constant 0 : index
    %c0_6 = arith.constant 0 : index
    %7 = vector.load %arg4[%c0_5, %c0_6] : memref<32x32xf32, #tpu.memory_space<vmem>>, vector<32x32xf32>
    %cst_7 = arith.constant dense<0.000000e+00> : vector<32x64xf32>
    %8 = tpu.matmul %7, %6, %cst_7 {dimension_numbers = #tpu.dot_dimension_numbers<[1], [0], [0], [1], [0, 0, 1, 1], [], []>} : vector<32x32xf32>, vector<32x64xf32>, vector<32x64xf32> -> vector<32x64xf32>
    %c0_8 = arith.constant 0 : index
    %c0_9 = arith.constant 0 : index
    %9 = vector.load %arg5[%c0_8, %c0_9] : memref<32x1xf32, #tpu.memory_space<vmem>>, vector<32x1xf32>
    %10 = vector.broadcast %9 : vector<32x1xf32> to vector<32x64xf32>
    %11 = arith.addf %8, %10 : vector<32x64xf32>
    %12 = math.tanh %11 : vector<32x64xf32>
    %c0_10 = arith.constant 0 : index
    %c0_11 = arith.constant 0 : index
    %13 = vector.load %arg6[%c0_10, %c0_11] : memref<16x32xf32, #tpu.memory_space<vmem>>, vector<16x32xf32>
    %cst_12 = arith.constant dense<0.000000e+00> : vector<16x64xf32>
    %14 = tpu.matmul %13, %12, %cst_12 {dimension_numbers = #tpu.dot_dimension_numbers<[1], [0], [0], [1], [0, 0, 1, 1], [], []>} : vector<16x32xf32>, vector<32x64xf32>, vector<16x64xf32> -> vector<16x64xf32>
    %c0_13 = arith.constant 0 : index
    %c0_14 = arith.constant 0 : index
    %15 = vector.load %arg7[%c0_13, %c0_14] : memref<16x1xf32, #tpu.memory_space<vmem>>, vector<16x1xf32>
    %16 = vector.broadcast %15 : vector<16x1xf32> to vector<16x64xf32>
    %17 = arith.addf %14, %16 : vector<16x64xf32>
    %cst_15 = arith.constant 0.000000e+00 : f32
    %18 = vector.broadcast %cst_15 : f32 to vector<16x64xf32>
    %19 = arith.subf %18, %17 : vector<16x64xf32>
    %20 = math.exp %19 : vector<16x64xf32>
    %cst_16 = arith.constant 1.000000e+00 : f32
    %21 = vector.broadcast %cst_16 : f32 to vector<16x64xf32>
    %22 = arith.addf %21, %20 : vector<16x64xf32>
    %23 = tpu.reciprocal %22 : vector<16x64xf32> -> vector<16x64xf32>
    %c0_17 = arith.constant 0 : index
    %c0_18 = arith.constant 0 : index
    %24 = vector.load %arg8[%c0_17, %c0_18] : memref<4x16xf32, #tpu.memory_space<vmem>>, vector<4x16xf32>
    %cst_19 = arith.constant dense<0.000000e+00> : vector<4x64xf32>
    %25 = tpu.matmul %24, %23, %cst_19 {dimension_numbers = #tpu.dot_dimension_numbers<[1], [0], [0], [1], [0, 0, 1, 1], [], []>} : vector<4x16xf32>, vector<16x64xf32>, vector<4x64xf32> -> vector<4x64xf32>
    %c0_20 = arith.constant 0 : index
    %c0_21 = arith.constant 0 : index
    %26 = vector.load %arg9[%c0_20, %c0_21] : memref<4x1xf32, #tpu.memory_space<vmem>>, vector<4x1xf32>
    %27 = vector.broadcast %26 : vector<4x1xf32> to vector<4x64xf32>
    %28 = arith.addf %25, %27 : vector<4x64xf32>
    %c0_22 = arith.constant 0 : index
    %c0_23 = arith.constant 0 : index
    %29 = vector.load %arg10[%c0_22, %c0_23] : memref<4x64xf32, #tpu.memory_space<vmem>>, vector<4x64xf32>
    tpu.vector_store %arg10[%c0_22, %c0_23], %28 {strides = array<i32>} : memref<4x64xf32, #tpu.memory_space<vmem>>, vector<4x64xf32>,
    return
  }
  func.func @transform_0(%arg0: i32) -> (i32, i32) {
    %c0_i32 = arith.constant 0 : i32
    %c0_i32_0 = arith.constant 0 : i32
    return %c0_i32, %arg0 : i32, i32
  }
  func.func @transform_1(%arg0: i32) -> (i32, i32) {
    %c0_i32 = arith.constant 0 : i32
    %c0_i32_0 = arith.constant 0 : i32
    %c0_i32_1 = arith.constant 0 : i32
    return %c0_i32, %c0_i32_0 : i32, i32
  }
  func.func @transform_2(%arg0: i32) -> (i32, i32) {
    %c0_i32 = arith.constant 0 : i32
    %c0_i32_0 = arith.constant 0 : i32
    %c0_i32_1 = arith.constant 0 : i32
    return %c0_i32, %c0_i32_0 : i32, i32
  }
  func.func @transform_3(%arg0: i32) -> (i32, i32) {
    %c0_i32 = arith.constant 0 : i32
    %c0_i32_0 = arith.constant 0 : i32
    %c0_i32_1 = arith.constant 0 : i32
    return %c0_i32, %c0_i32_0 : i32, i32
  }
  func.func @transform_4(%arg0: i32) -> (i32, i32) {
    %c0_i32 = arith.constant 0 : i32
    %c0_i32_0 = arith.constant 0 : i32
    %c0_i32_1 = arith.constant 0 : i32
    return %c0_i32, %c0_i32_0 : i32, i32
  }
  func.func @transform_5(%arg0: i32) -> (i32, i32) {
    %c0_i32 = arith.constant 0 : i32
    %c0_i32_0 = arith.constant 0 : i32
    %c0_i32_1 = arith.constant 0 : i32
    return %c0_i32, %c0_i32_0 : i32, i32
  }
  func.func @transform_6(%arg0: i32) -> (i32, i32) {
    %c0_i32 = arith.constant 0 : i32
    %c0_i32_0 = arith.constant 0 : i32
    %c0_i32_1 = arith.constant 0 : i32
    return %c0_i32, %c0_i32_0 : i32, i32
  }
  func.func @transform_7(%arg0: i32) -> (i32, i32) {
    %c0_i32 = arith.constant 0 : i32
    %c0_i32_0 = arith.constant 0 : i32
    %c0_i32_1 = arith.constant 0 : i32
    return %c0_i32, %c0_i32_0 : i32, i32
  }
  func.func @transform_8(%arg0: i32) -> (i32, i32) {
    %c0_i32 = arith.constant 0 : i32
    %c0_i32_0 = arith.constant 0 : i32
    %c0_i32_1 = arith.constant 0 : i32
    return %c0_i32, %c0_i32_0 : i32, i32
  }
  func.func @transform_9(%arg0: i32) -> (i32, i32) {
    %c0_i32 = arith.constant 0 : i32
    %c0_i32_0 = arith.constant 0 : i32
    return %c0_i32, %arg0 : i32, i32
  }
}

</mosaic_0001>

<bundles_post_ra>
// kernel: tpu_custom_call.1
= control target key start
LH: loop header
LB: loop body
LE: loop exit
PB: predicated region body
PF: predicated region fallthrough
CT: control target
= control target key end

     0   :  { %vm63_vm0 = vcmask 130048   ;;  %v650_v4 = vmov 0   ;;  %s800_s0 = inlined_call_operand.vmem [shape: f32[16,64], index: 0, kind: input, shape index: {}]   ;;  %s801_s1 = inlined_call_operand.vmem [shape: f32[32,16], index: 1, kind: input, shape index: {}]   ;;  %s802_s2 = inlined_call_operand.vmem [shape: f32[32,1], index: 2, kind: input, shape index: {}]   ;;  %s803_s3 = inlined_call_operand.vmem [shape: f32[32,32], index: 3, kind: input, shape index: {}]   ;;  %s804_s4 = inlined_call_operand.vmem [shape: f32[32,1], index: 4, kind: input, shape index: {}]   ;;  %s805_s5 = inlined_call_operand.vmem [shape: f32[16,32], index: 5, kind: input, shape index: {}]   ;;  %s806_s6 = inlined_call_operand.vmem [shape: f32[16,1], index: 6, kind: input, shape index: {}]   ;;  %s807_s7 = inlined_call_operand.vmem [shape: f32[4,16], index: 7, kind: input, shape index: {}]   ;;  %s808_s8 = inlined_call_operand.vmem [shape: f32[4,1], index: 8, kind: input, shape index: {}]   ;;  %s809_s9 = inlined_call_operand.hbm [shape: f32[4,64], index: 9, kind: output, shape index: {}]  }
   0x1   :  { %v33_v0 = vld [vmem:[%s800_s0] sm:$0xff]  ;;  %v34_v1 = vld [vmem:[%s800_s0 + $0x8] sm:$0xff]  ;;  %600 = vset.pattern.permute.xlu0 %v650_v4  ;;  %601 = vset.pattern.permute.xlu1 %v650_v4  ;;  %v41_v6 = vld [vmem:[%s802_s2 + $0x10] sm:$0xff] }
   0x2   :  { %v35_v2 = vld [vmem:[%s801_s1] sm:$0xff]  ;;  %v572_v3 = vpack.c.bf16 %v34_v1, %v33_v0  ;;  %v36_v7 = vld [vmem:[%s801_s1 + $0x8] sm:$0xff]  ;;  %55 = vperm.xlu1 %601, %v41_v6   ;;  %v37_v9 = vld [vmem:[%s801_s1 + $0x10] sm:$0xff] }
   0x3   :  { %534 = vmatprep.mubr.msk.f32.mxu0 %vm63_vm0, %v35_v2  ;;  %v39_v5 = vld [vmem:[%s802_s2] sm:$0xff]  ;;  %v40_v8 = vld [vmem:[%s802_s2 + $0x8] sm:$0xff]  ;;  %v42_v10 = vld [vmem:[%s802_s2 + $0x18] sm:$0xff] }
   0x4   :  { %573 = vmatprep.subr.bf16.mxu0 %v572_v3  ;;  %45 = vperm.xlu0 %600, %v39_v5  }
   0x5   :  { %575 = vmatpush3.bf16.msra.mxu0 %v572_v3 }
   0x6   :  { %14 = vsyncpa [#allocation3], 0  ;;  %v38_v11 = vld [vmem:[%s801_s1 + $0x18] sm:$0xff]  ;;  %v169_v12 = vld [vmem:[%s804_s4] sm:$0xff]  ;;  %60 = vperm.xlu1 %601, %v42_v10   ;;  %vm193_vm1 = vcmask 261120   ;;  %v651_v61 = vmov 0.0|0.0  }
   0x7   :  { %v170_v13 = vld [vmem:[%s804_s4 + $0x8] sm:$0xff]  ;;  %v171_v14 = vld [vmem:[%s804_s4 + $0x10] sm:$0xff]  ;;  %v172_v15 = vld [vmem:[%s804_s4 + $0x18] sm:$0xff]  ;;  %vm652_vm2 = vmmov 0   ;;  %v653_v62 = vmov 0.0   ;;  %s654_s27 = smov [#allocation2]  }
   0x8   :  { %535 = vmatmul.mubr.msk.f32.vlgmr.msra.gmra.mrb[0].mxu0 %vm63_vm0, %v36_v7  ;;  %50 = vperm.xlu0 %600, %v40_v8   ;;  %v297_v16 = vld [vmem:[%s806_s6] sm:$0xff]  ;;  %v298_v17 = vld [vmem:[%s806_s6 + $0x8] sm:$0xff]  ;;  %v167_v39 = vld [vmem:[%s803_s3 + $0x10] sm:$0xff]  ;;  %s488_s28 = sshll.u32 %s654_s27, 4  ;;  %vm480_vm3 = vcmask 519168   ;;  %s489_s28 = int_to_ptr.vmem [resolvable:$true] %s488_s28 }
   0x9   :  { %537 = vmatprep.mubr.msk.f32.mxu0 %vm63_vm0, %v37_v9  ;;  %v401_v18 = vld [vmem:[%s808_s8] sm:$0xf]  ;;  %v166_v38 = vld [vmem:[%s803_s3 + $0x8] sm:$0xff]  ;;  %v168_v40 = vld [vmem:[%s803_s3 + $0x18] sm:$0xff]  ;;  %s626_s29 = scalar_lea.vmem %s489_s28, 64  ;;  %p631_p1 = scmp.lt.s32.totalorder %s489_s28, %s489_s28 }
   0xa   :  { %180 = vperm.xlu1 %601, %v170_v13   ;;  %v165_v19 = vld [vmem:[%s803_s3] sm:$0xff]  ;;  %v296_v60 = vld [vmem:[%s805_s5 + $0x8] sm:$0xff]  ;;  %p627_p0 = scmp.ne.s32.totalorder %s489_s28, %s626_s29  ;;  %p632_p2 = scmp.lt.s32.totalorder %s626_s29, %s626_s29 }
   0xb   :  { %548 = vmatprep.mubr.msk.f32.mxu1 %vm193_vm1, %v165_v19  ;;  %v295_v41 = vld [vmem:[%s805_s5] sm:$0xff] }
   0xc   :  { %538 = vmatmul.mubr.msk.f32.gmra.mrb[2].mxu0 %vm63_vm0, %v38_v11  ;;  %175 = vperm.xlu0 %600, %v169_v12   ;;  %p633_p3 = por %p632_p2, %p631_p1 }
   0xd   :  { %562 = vmatprep.mubr.msk.f32.mxu0 %vm193_vm1, %v295_v41 }
   0xe   :  { %190 = vperm.xlu1 %601, %v172_v15   ;;  %p634_p4 = pnand %p633_p3, %p627_p0 }
  0x10   :  { %185 = vperm.xlu0 %600, %v171_v14  }
  0x12   :  { %306 = vperm.xlu1 %601, %v298_v17  }
  0x14   :  { %301 = vperm.xlu0 %600, %v297_v16   ;;  %v400_v16 = vld [vmem:[%s807_s7] sm:$0xf] }
  0x18   :  { %404 = vperm.xlu0 %600, %v401_v18  }
  0x81   :  { %v56_v21 = vpop.permute.xlu1 %55 }
  0x83   :  { %v46_v20 = vpop.permute.xlu0 %45 }
  0x85   :  { %v61_v27 = vpop.permute.xlu1 %60 }
  0x87   :  { %v51_v22 = vpop.permute.xlu0 %50 }
  0x89   :  { %v181_v42 = vpop.permute.xlu1 %180 }
  0x8b   :  { %v176_v43 = vpop.permute.xlu0 %175 }
  0x8d   :  { %v191_v48 = vpop.permute.xlu1 %190 }
  0x8f   :  { %v186_v50 = vpop.permute.xlu0 %185 }
  0x91   :  { %v307_v63 = vpop.permute.xlu1 %306 }
  0x93   :  { %v302_v1 = vpop.permute.xlu0 %301 }
  0x97   :  { %v405_v17 = vpop.permute.xlu0 %404 }
  0xdb   :  { %v536_v23 = vpop.f32.mrb[0].mxu0 }
  0xdc   :  { %v148_v24 = vadd.f32 %v536_v23, %v51_v22  ;;  %v142_v25 = vpop.f32.mrb[1].mxu0 }
  0xdd   :  { %v143_v26 = vadd.f32 %v142_v25, %v46_v20 }
  0xde   :  { %602 = vtanh.f32 %v148_v24 }
  0xdf   :  { %604 = vtanh.f32 %v143_v26  ;;  %v539_v28 = vpop.f32.mrb[2].mxu0 }
  0xe0   :  { %v158_v29 = vadd.f32 %v539_v28, %v61_v27  ;;  %v152_v30 = vpop.f32.mrb[3].mxu0 }
  0xe1   :  { %v153_v31 = vadd.f32 %v152_v30, %v56_v21 }
  0xe2   :  { %606 = vtanh.f32 %v158_v29 }
  0xe3   :  { %608 = vtanh.f32 %v153_v31 }
  0xe8   :  { %v603_v32 = vpop.eup %602 }
  0xe9   :  { %v605_v33 = vpop.eup %604 }
  0xea   :  { %v576_v34 = vpack.c.bf16 %v603_v32, %v605_v33 }
  0xec   :  { %v607_v35 = vpop.eup %606  ;;  %577 = vmatprep.subr.bf16.mxu1 %v576_v34 }
  0xed   :  { %v609_v36 = vpop.eup %608  ;;  %579 = vmatpush3.bf16.msra.mxu1 %v576_v34 }
  0xee   :  { %v580_v37 = vpack.c.bf16 %v607_v35, %v609_v36 }
  0xf0   :  { %581 = vmatprep.subr.bf16.mxu1 %v580_v37 }
  0xf1   :  { %583 = vmatpush3.bf16.msra.mxu1 %v580_v37 }
  0xf4   :  { %549 = vmatmul.mubr.msk.f32.vlgmr.msra.gmra.mrb[0].mxu1 %vm193_vm1, %v166_v38 }
  0xf5   :  { %551 = vmatprep.mubr.msk.f32.mxu1 %vm193_vm1, %v167_v39 }
  0xf8   :  { %552 = vmatmul.mubr.msk.f32.gmra.mrb[2].mxu1 %vm193_vm1, %v168_v40 }
 0x1c7   :  { %v550_v44 = vpop.f32.mrb[0].mxu1 }
 0x1c8   :  { %v278_v45 = vadd.f32 %v550_v44, %v181_v42  ;;  %v272_v46 = vpop.f32.mrb[1].mxu1 }
 0x1c9   :  { %v273_v47 = vadd.f32 %v272_v46, %v176_v43 }
 0x1ca   :  { %610 = vtanh.f32 %v278_v45 }
 0x1cb   :  { %612 = vtanh.f32 %v273_v47  ;;  %v553_v49 = vpop.f32.mrb[2].mxu1 }
 0x1cc   :  { %v288_v51 = vadd.f32 %v553_v49, %v191_v48  ;;  %v282_v52 = vpop.f32.mrb[3].mxu1 }
 0x1cd   :  { %v283_v53 = vadd.f32 %v282_v52, %v186_v50 }
 0x1ce   :  { %614 = vtanh.f32 %v288_v51 }
 0x1cf   :  { %616 = vtanh.f32 %v283_v53 }
 0x1d4   :  { %v611_v54 = vpop.eup %610 }
 0x1d5   :  { %v613_v55 = vpop.eup %612 }
 0x1d6   :  { %v584_v56 = vpack.c.bf16 %v611_v54, %v613_v55 }
 0x1d8   :  { %v615_v57 = vpop.eup %614  ;;  %585 = vmatprep.subr.bf16.mxu0 %v584_v56 }
 0x1d9   :  { %v617_v58 = vpop.eup %616  ;;  %587 = vmatpush3.bf16.msra.mxu0 %v584_v56 }
 0x1da   :  { %v588_v59 = vpack.c.bf16 %v615_v57, %v617_v58 }
 0x1dc   :  { %589 = vmatprep.subr.bf16.mxu0 %v588_v59 }
 0x1dd   :  { %591 = vmatpush3.bf16.msra.mxu0 %v588_v59 }
 0x1de   :  { %592 = vmatprep.subr.bf16.mxu0 %v651_v61 }
 0x1e0   :  { %563 = vmatmul.mubr.msk.f32.vlgmr.msra.gmra.mrb[4].mxu0 %vm193_vm1, %v296_v60 }
 0x1e1   :  { %569 = vmatprep.mubr.msk.f32.mxu0 %vm652_vm2, %v653_v62 }
 0x2b3   :  { %v564_v0 = vpop.f32.mrb[4].mxu0 }
 0x2b4   :  { %v387_v2 = vadd.f32 %v564_v0, %v307_v63  ;;  %v381_v3 = vpop.f32.mrb[5].mxu0 }
 0x2b5   :  { %v382_v4 = vadd.f32 %v381_v3, %v302_v1 }
 0x2b6   :  { %v391_v5 = vsub.f32 0.0, %v387_v2 }
 0x2b7   :  { %v390_v6 = vsub.f32 0.0, %v382_v4 }
 0x2b8   :  { %v394_v7 = vmul.f32 1.442695, %v391_v5 }
 0x2b9   :  { %v392_v8 = vmul.f32 1.442695, %v390_v6 }
 0x2ba   :  { %618 = vpow2.f32 %v394_v7 }
 0x2bb   :  { %620 = vpow2.f32 %v392_v8 }
 0x2c4   :  { %v619_v9 = vpop.eup %618 }
 0x2c5   :  { %v621_v10 = vpop.eup %620  ;;  %v397_v11 = vadd.f32 1.0, %v619_v9 }
 0x2c6   :  { %v396_v12 = vadd.f32 1.0, %v621_v10 }
 0x2c7   :  { %622 = vrcp.f32 %v397_v11 }
 0x2c8   :  { %624 = vrcp.f32 %v396_v12 }
 0x2d1   :  { %v623_v13 = vpop.eup %622 }
 0x2d2   :  { %v625_v14 = vpop.eup %624 }
 0x2d3   :  { %v593_v15 = vpack.c.bf16 %v623_v13, %v625_v14 }
 0x2d5   :  { %594 = vmatpush3.bf16.msra.mxu0 %v593_v15 }
 0x2d8   :  { %570 = vmatmul.mubr.msk.f32.vlgmr.msra.gmra.mrb[6].mxu0 %vm63_vm0, %v400_v16 }
 0x3ab   :  { %v476_v18 = vpop.f32.mrb[6].mxu0 }
 0x3ac   :  { %v477_v19 = vadd.f32 %v476_v18, %v405_v17  ;;  %v571_v20 = vpop.f32.mrb[7].mxu0 }
 0x3ae   :  { %481 = vst.msk [vmem:[#allocation2] sm:$0xf] %vm480_vm3, %v477_v19 }
 0x3af   :  { %637 = shalt.err (!%p634_p4)
}
 0x3b0   :  { %s638_s10 = scalar_lea.hbm %s809_s9, 64 }
 0x3b1   :  { %p639_p5 = scmp.ne.s32.totalorder %s809_s9, %s638_s10  ;;  %p642_p6 = scmp.lt.u32.totalorder %s638_s10, %s809_s9 }
 0x3b3   :  { %p644_p7 = pnand %p642_p6, %p639_p5 }
 0x3b5   :  { %647 = shalt.err (!%p644_p7)
}
 0x3b6   :  { %491 = dma.vmem_to_hbm [thread:$0]  %s489_s28, 64, %s809_s9, [#allocation3]  }
 0x3b7   :  { %648 = dma.done.wait [#allocation3], 64  }
 0x3b8   :  { %649 = vsyncadd [#allocation3], 4294967232 }
 0x3b9   :  { %495 = vsyncpa [#allocation3], 1 }

</bundles_post_ra>
